<compile_context>
chip_gen: v7x
topology: tpu7x:2x2x1
jax: 0.10.0
libtpu: 0.0.40
codegen_flags: <defaults>
</compile_context>

<pallas_src>
import functools

import numpy as np
import jax
import jax.numpy as jnp
from jax.experimental import pallas as pl
from jax.experimental.pallas import tpu as pltpu


_N_CORES = 2            # leading "parallel" grid axis (2 TCs on v7x; harmless on 1-TC chips)
_OUT_SUB, _OUT_LANE = 8, 128   # (8,128)-aligned per-core scalar output block


def _round_up(x, m):
    return ((x + m - 1) // m) * m


def _choose_row_tile(n):
    # Keep a double-buffered (tm, n) f32 input tile plus same-size intermediates
    # comfortably inside the scoped-VMEM budget on v5e / v6e / v7x.
    per_buf_bytes = 2 * 1024 * 1024
    tm = min(256, max(8, per_buf_bytes // max(4 * n, 1)), _round_up(n, 8))
    return max(8, (tm // 8) * 8)


def _top1_max_kernel(logit_ref, loss_ref, acc_ref, *, n_valid, tm, scale):
    j = pl.program_id(1)

    @pl.when(j == 0)
    def _init():
        acc_ref[...] = jnp.zeros_like(acc_ref)

    logit = logit_ref[...].astype(jnp.float32)              # (tm, n) — upcast on load

    # global row index of every sublane of this tile
    block_idx = pl.program_id(0) * pl.num_programs(1) + j
    row_iota = jax.lax.broadcasted_iota(jnp.int32, (tm, 1), 0)
    grow = row_iota + block_idx * tm                         # (tm, 1)

    # diagonal logit[i, i]: single column iota compared with the global row idx
    cols = jax.lax.broadcasted_iota(jnp.int32, logit.shape, 1)
    diag = jnp.sum(jnp.where(cols == grow, logit, 0.0), axis=-1, keepdims=True)

    # shared exponentials for softmax numerator and sigmoid(logit - diag)
    m = jnp.max(logit, axis=-1, keepdims=True)
    e = jnp.exp(logit - m)                                   # (tm, n)
    inv_l = pl.reciprocal(jnp.sum(e, axis=-1, keepdims=True), approx=True)  # (tm, 1)
    ed = jnp.exp(jnp.maximum(diag - m, -80.0))               # (tm, 1); diag <= m
    sig_diff = e * pl.reciprocal(e + ed, approx=True)        # == sigmoid(logit - diag)
    sig_sq = jax.nn.sigmoid(logit * logit)

    # softmax applied once per row (multiply the row sum by inv_l)
    row_contrib = jnp.sum(e * (sig_diff + sig_sq), axis=-1, keepdims=True) * inv_l
    row_contrib = jnp.where(grow < n_valid, row_contrib, 0.0)   # drop padded rows

    acc_ref[...] += jnp.sum(row_contrib, axis=0, keepdims=True)

    @pl.when(j == pl.num_programs(1) - 1)
    def _finalize():
        loss_ref[...] = jnp.broadcast_to(acc_ref[...] * scale, loss_ref.shape)


def _pallas_top1_max(logit_padded, n_valid, tm):
    n_pad, n = logit_padded.shape
    steps_per_core = n_pad // (_N_CORES * tm)

    kernel = functools.partial(
        _top1_max_kernel,
        n_valid=n_valid,
        tm=tm,
        scale=1.0 / float(n_valid * n_valid),
    )

    out = pl.pallas_call(
        kernel,
        out_shape=jax.ShapeDtypeStruct((_N_CORES * _OUT_SUB, _OUT_LANE), jnp.float32),
        grid_spec=pltpu.PrefetchScalarGridSpec(
            num_scalar_prefetch=0,
            grid=(_N_CORES, steps_per_core),
            in_specs=[
                pl.BlockSpec((tm, n), lambda c, j: (c * steps_per_core + j, 0)),
            ],
            out_specs=pl.BlockSpec((_OUT_SUB, _OUT_LANE), lambda c, j: (c, 0)),
            scratch_shapes=[pltpu.VMEM((1, 1), jnp.float32)],
        ),
        compiler_params=pltpu.CompilerParams(
            dimension_semantics=("parallel", "arbitrary"),
            vmem_limit_bytes=32 * 1024 * 1024,
        ),
        cost_estimate=pl.CostEstimate(
            flops=10 * n_valid * n_valid,
            transcendentals=3 * n_valid * n_valid,
            bytes_accessed=4 * n_pad * n,
        ),
    )(logit_padded)

    # one scalar partial per core lives at sublane c*8, lane 0
    partials = out.reshape(_N_CORES, _OUT_SUB, _OUT_LANE)[:, 0, 0]
    return jnp.sum(partials)


def top1_max_loss(preds, targets, padd_idx):
    """Matches TOP1_max.forward. preds: (B, S+1, V) float; targets: (B, S) int."""
    preds = jnp.asarray(preds)[:, :-1, :]
    B, S, V = preds.shape
    preds_flat = preds.reshape(B * S, V)

    # TODO(synk): fold this data-dependent boolean mask + fancy-index gather into
    # the kernel via scalar-prefetched (valid_rows, valid_tgts) so the op is
    # jit-able and skips the (N, N) HBM round trip.
    t_flat = np.asarray(targets).reshape(-1)
    mask = t_flat != padd_idx
    valid_rows = np.nonzero(mask)[0]
    valid_tgts = t_flat[mask]
    n = int(valid_rows.shape[0])
    if n == 0:                              # all positions padded -> empty mean
        return jnp.zeros((), jnp.float32)

    logit = preds_flat[valid_rows][:, valid_tgts]            # (n, n), preds dtype

    tm = _choose_row_tile(n)
    n_pad = _round_up(n, _N_CORES * tm)
    if n_pad != n:
        logit = jnp.pad(logit, ((0, n_pad - n), (0, 0)))     # padded rows masked in-kernel
    return _pallas_top1_max(logit, n, tm)


def _reference(preds, targets, padd_idx):
    """Pure NumPy (float64) reference mirroring the PyTorch forward."""
    preds = np.asarray(preds, dtype=np.float64)[:, :-1, :]
    V = preds.shape[-1]
    pf = preds.reshape(-1, V)
    t = np.asarray(targets).reshape(-1)
    m = t != padd_idx
    logit = pf[m][:, t[m]]
    ls = np.exp(logit - logit.max(axis=1, keepdims=True))
    ls = ls / ls.sum(axis=1, keepdims=True)
    diag = np.diag(logit).reshape(-1, 1)
    diff = logit - diag
    sig = lambda x: 1.0 / (1.0 + np.exp(-x))
    return np.mean(ls * (sig(diff) + sig(logit ** 2)))


if __name__ == "__main__":
    # Small deterministic example: batch=2, seq=8 (preds carries seq+1 steps),
    # vocab/item count=32.  TOP1_max has no learnable parameters (only padd_idx).
    B, S, V = 2, 8, 32
    padd_idx = 0

    key = jax.random.PRNGKey(0)
    kp, kt = jax.random.split(key)
    preds = jax.random.normal(kp, (B, S + 1, V), dtype=jnp.float32)
    targets = jax.random.randint(kt, (B, S), 1, V, dtype=jnp.int32)
    # inject a few padding positions so the mask path is exercised (N = 13)
    targets = targets.at[0, 3].set(padd_idx)
    targets = targets.at[1, 0].set(padd_idx)
    targets = targets.at[1, 5].set(padd_idx)

    loss = top1_max_loss(preds, targets, padd_idx)
    loss = jax.block_until_ready(loss)

    ref = _reference(preds, targets, padd_idx)
    np.testing.assert_allclose(np.asarray(loss), ref, rtol=1e-3, atol=1e-6)
    print("KERNEL_OK")
</pallas_src>

<mosaic_0001>
module attributes {stable_mosaic.version = 11 : i64} {
  func.func @_top1_max_kernel(%arg0: i32, %arg1: i32, %arg2: memref<16x13xf32, #tpu.memory_space<vmem>>, %arg3: memref<8x128xf32, #tpu.memory_space<vmem>>, %arg4: memref<1x1xf32, #tpu.memory_space<vmem>>) attributes {dimension_semantics = [#tpu.dimension_semantics<parallel>, #tpu.dimension_semantics<arbitrary>], iteration_bounds = array<i64: 2, 1>, scalar_prefetch = 0 : i64, scratch_operands = 1 : i64, tpu.core_type = #tpu.core_type<tc>, window_params = [{transform_indices = @transform_0, window_bounds = array<i64: 16, 13>}, {transform_indices = @transform_1, window_bounds = array<i64: 8, 128>}]} {
    %c0_i32 = arith.constant 0 : i32
    %0 = arith.cmpi eq, %arg1, %c0_i32 : i32
    %1 = arith.extui %0 : i1 to i32
    %c0_i32_0 = arith.constant 0 : i32
    %2 = arith.cmpi ne, %1, %c0_i32_0 : i32
    scf.if %2 {
      %cst_16 = arith.constant 0.000000e+00 : f32
      %56 = vector.broadcast %cst_16 : f32 to vector<1x1xf32>
      %c0_17 = arith.constant 0 : index
      %c0_18 = arith.constant 0 : index
      %57 = vector.load %arg4[%c0_17, %c0_18] : memref<1x1xf32, #tpu.memory_space<vmem>>, vector<1x1xf32>
      tpu.vector_store %arg4[%c0_17, %c0_18], %56 {strides = array<i32>} : memref<1x1xf32, #tpu.memory_space<vmem>>, vector<1x1xf32>,
    } else {
    }
    %c0 = arith.constant 0 : index
    %c0_1 = arith.constant 0 : index
    %3 = vector.load %arg2[%c0, %c0_1] : memref<16x13xf32, #tpu.memory_space<vmem>>, vector<16x13xf32>
    %c1_i32 = arith.constant 1 : i32
    %4 = arith.muli %arg0, %c1_i32 : i32
    %5 = arith.addi %4, %arg1 : i32
    %6 = tpu.iota {dimensions = array<i32: 0>} : vector<16x1xi32>
    %c16_i32 = arith.constant 16 : i32
    %7 = arith.muli %5, %c16_i32 : i32
    %8 = vector.broadcast %7 : i32 to vector<16x1xi32>
    %9 = arith.addi %6, %8 : vector<16x1xi32>
    %10 = tpu.iota {dimensions = array<i32: 1>} : vector<16x13xi32>
    %11 = vector.broadcast %9 : vector<16x1xi32> to vector<16x13xi32>
    %12 = arith.cmpi eq, %10, %11 : vector<16x13xi32>
    %cst = arith.constant 0.000000e+00 : f32
    %13 = vector.broadcast %cst : f32 to vector<16x13xf32>
    %14 = arith.select %12, %3, %13 : vector<16x13xi1>, vector<16x13xf32>
    %cst_2 = arith.constant dense<0.000000e+00> : vector<16xf32>
    %15 = vector.multi_reduction <add>, %14, %cst_2 [1] : vector<16x13xf32> to vector<16xf32>
    %16 = vector.shape_cast %15 : vector<16xf32> to vector<16x1xf32>
    %cst_3 = arith.constant dense<0xFF800000> : vector<16xf32>
    %17 = vector.multi_reduction <maximumf>, %3, %cst_3 [1] : vector<16x13xf32> to vector<16xf32>
    %18 = vector.shape_cast %17 : vector<16xf32> to vector<16x1xf32>
    %19 = vector.broadcast %18 : vector<16x1xf32> to vector<16x13xf32>
    %20 = arith.subf %3, %19 : vector<16x13xf32>
    %21 = math.exp %20 : vector<16x13xf32>
    %cst_4 = arith.constant dense<0.000000e+00> : vector<16xf32>
    %22 = vector.multi_reduction <add>, %21, %cst_4 [1] : vector<16x13xf32> to vector<16xf32>
    %23 = vector.shape_cast %22 : vector<16xf32> to vector<16x1xf32>
    %24 = tpu.reciprocal %23 {approx = true} : vector<16x1xf32> -> vector<16x1xf32>
    %25 = arith.subf %16, %18 : vector<16x1xf32>
    %cst_5 = arith.constant -8.000000e+01 : f32
    %26 = vector.broadcast %cst_5 : f32 to vector<16x1xf32>
    %27 = arith.maximumf %25, %26 : vector<16x1xf32>
    %28 = math.exp %27 : vector<16x1xf32>
    %29 = vector.broadcast %28 : vector<16x1xf32> to vector<16x13xf32>
    %30 = arith.addf %21, %29 : vector<16x13xf32>
    %31 = tpu.reciprocal %30 {approx = true} : vector<16x13xf32> -> vector<16x13xf32>
    %32 = arith.mulf %21, %31 : vector<16x13xf32>
    %33 = arith.mulf %3, %3 : vector<16x13xf32>
    %34 = arith.negf %33 : vector<16x13xf32>
    %35 = math.exp %34 : vector<16x13xf32>
    %cst_6 = arith.constant 1.000000e+00 : f32
    %36 = vector.broadcast %cst_6 : f32 to vector<16x13xf32>
    %37 = arith.addf %36, %35 : vector<16x13xf32>
    %38 = arith.divf %36, %37 : vector<16x13xf32>
    %39 = arith.addf %32, %38 : vector<16x13xf32>
    %40 = arith.mulf %21, %39 : vector<16x13xf32>
    %cst_7 = arith.constant dense<0.000000e+00> : vector<16xf32>
    %41 = vector.multi_reduction <add>, %40, %cst_7 [1] : vector<16x13xf32> to vector<16xf32>
    %42 = vector.shape_cast %41 : vector<16xf32> to vector<16x1xf32>
    %43 = arith.mulf %42, %24 : vector<16x1xf32>
    %c13_i32 = arith.constant 13 : i32
    %44 = vector.broadcast %c13_i32 : i32 to vector<16x1xi32>
    %45 = arith.cmpi slt, %9, %44 : vector<16x1xi32>
    %cst_8 = arith.constant 0.000000e+00 : f32
    %46 = vector.broadcast %cst_8 : f32 to vector<16x1xf32>
    %47 = arith.select %45, %43, %46 : vector<16x1xi1>, vector<16x1xf32>
    %c0_9 = arith.constant 0 : index
    %c0_10 = arith.constant 0 : index
    %48 = vector.load %arg4[%c0_9, %c0_10] : memref<1x1xf32, #tpu.memory_space<vmem>>, vector<1x1xf32>
    %cst_11 = arith.constant dense<0.000000e+00> : vector<1xf32>
    %49 = vector.multi_reduction <add>, %47, %cst_11 [0] : vector<16x1xf32> to vector<1xf32>
    %50 = vector.shape_cast %49 : vector<1xf32> to vector<1x1xf32>
    %51 = arith.addf %48, %50 : vector<1x1xf32>
    %c0_12 = arith.constant 0 : index
    %c0_13 = arith.constant 0 : index
    %52 = vector.load %arg4[%c0_12, %c0_13] : memref<1x1xf32, #tpu.memory_space<vmem>>, vector<1x1xf32>
    tpu.vector_store %arg4[%c0_12, %c0_13], %51 {strides = array<i32>} : memref<1x1xf32, #tpu.memory_space<vmem>>, vector<1x1xf32>,
    %c0_i32_14 = arith.constant 0 : i32
    %53 = arith.cmpi eq, %arg1, %c0_i32_14 : i32
    %54 = arith.extui %53 : i1 to i32
    %c0_i32_15 = arith.constant 0 : i32
    %55 = arith.cmpi ne, %54, %c0_i32_15 : i32
    scf.if %55 {
      %c0_16 = arith.constant 0 : index
      %c0_17 = arith.constant 0 : index
      %56 = vector.load %arg4[%c0_16, %c0_17] : memref<1x1xf32, #tpu.memory_space<vmem>>, vector<1x1xf32>
      %cst_18 = arith.constant 5.917160e-03 : f32
      %57 = vector.broadcast %cst_18 : f32 to vector<1x1xf32>
      %58 = arith.mulf %56, %57 : vector<1x1xf32>
      %59 = vector.shape_cast %58 : vector<1x1xf32> to vector<1x1xf32>
      %60 = vector.broadcast %59 : vector<1x1xf32> to vector<8x128xf32>
      %c0_19 = arith.constant 0 : index
      %c0_20 = arith.constant 0 : index
      %61 = vector.load %arg3[%c0_19, %c0_20] : memref<8x128xf32, #tpu.memory_space<vmem>>, vector<8x128xf32>
      tpu.vector_store %arg3[%c0_19, %c0_20], %60 {strides = array<i32>} : memref<8x128xf32, #tpu.memory_space<vmem>>, vector<8x128xf32>,
    } else {
    }
    return
  }
  func.func @transform_0(%arg0: i32, %arg1: i32) -> (i32, i32) {
    %c1_i32 = arith.constant 1 : i32
    %0 = arith.muli %arg0, %c1_i32 : i32
    %1 = arith.addi %0, %arg1 : i32
    %c0_i32 = arith.constant 0 : i32
    %c0_i32_0 = arith.constant 0 : i32
    return %1, %c0_i32 : i32, i32
  }
  func.func @transform_1(%arg0: i32, %arg1: i32) -> (i32, i32) {
    %c0_i32 = arith.constant 0 : i32
    %c0_i32_0 = arith.constant 0 : i32
    return %arg0, %c0_i32 : i32, i32
  }
}

</mosaic_0001>

<bundles_post_ra>
// kernel: tpu_custom_call.1
= control target key start
LH: loop header
LB: loop body
LE: loop exit
PB: predicated region body
PF: predicated region fallthrough
CT: control target
= control target key end

     0   :  { %6 = vsyncpa [#allocation4], 0  ;;  %s661_s0 = inlined_call_operand.vmem [shape: f32[32,13], index: 0, kind: input, shape index: {}]   ;;  %s662_s1 = inlined_call_operand.hbm [shape: f32[16,128], index: 1, kind: output, shape index: {}]  }
   0x1   :  { %8 = vsyncpa [#allocation4 + $0x1], 0  ;;  %s526_s6 = smov 0   ;;  %s528_s7 = smov 0  }
   0x2   :  { %s530_s8 = smov 0   ;;  %s532_s9 = smov 0  }
   0x3   :  { %s534_s10 = smov 0   ;;  %s536_s11 = smov 0  }
   0x4 LB: > { %s336_s12 = sadd.s32 4294967295, %s511_s11   ;;  %s337_s13 = sadd.s32 4294967294, %s511_s11   ;;  %s511_s11 = sphi %s536_s11, %s14_s11   ;;  %s507_s10 = sphi %s534_s10, %s669_s10   ;;  %s503_s9 = sphi %s532_s9, %s668_s9   ;;  %s499_s8 = sphi %s530_s8, %s667_s8   ;;  %s495_s7 = sphi %s528_s7, %s666_s7   ;;  %s491_s6 = sphi %s526_s6, %s665_s6  }
   0x5   : > { %s26_s14 = sadd.s32 1, %s507_s10  ;;  %s61_s15 = sadd.s32 1, %s499_s8 }
   0x6   : > { %p28_p0 = scmp.ge.s32.totalorder %s26_s14, 2  ;;  %p71_p1 = scmp.ne.s32.totalorder %s499_s8, %s495_s7 }
   0x7   : > { %p72_p2 = scmp.eq.s32.totalorder %s336_s12, 1  ;;  %p77_p3 = scmp.ne.s32.totalorder %s495_s7, %s491_s6 }
   0x8   : > { %s671_s14 = smov (%p28_p0, %s26_s14), 0  ;;  %p78_p5 = scmp.eq.s32.totalorder %s337_s13, 1 }
   0x9   : > { %p566_p4 = por %p72_p2, %p71_p1  ;;  %s58_s17 = ssub.s32 %s507_s10, %s671_s14 }
   0xa   : > { %p340_p6 = scmp.ge.s32.totalorder %s511_s11, 1  ;;  %p59_p7 = scmp.eq.s32.totalorder %s58_s17, 0 }
   0xb   : > { %p573_p8 = por %p78_p5, %p77_p3  ;;  %p107_p9 = scmp.lt.s32.totalorder %s511_s11, 3 }
   0xc   : > { %s579_s19 = scalar_select %p59_p7, %s499_s8, %s61_s15  }
   0xd   : > { %p108_p10 = pnand %p340_p6, %p107_p9 }
   0xe   : > { %s342_s20 = sshll.u32 (!%p108_p10), %s503_s9, 1  ;;  %v145_v0 = vlaneseq (!%p108_p10)  ;;  %s344_s21 = sshll.u32 (!%p108_p10), %s503_s9, 4  ;;  %vm158_vm0 = vcmask (!%p108_p10), 105472   ;;  %vm140_vm3 = vcmask (!%p108_p10), 0   ;;  %v513_v57 = vmov (!%p108_p10), 0.0  }
   0xf   : > { %111 = sbr.rel (%p108_p10) target bundleno = 526 (0x20e), region = 24  ;;  %p130_p11 = scmp.lt.s32.totalorder (!%p108_p10), %s342_s20, 3  ;;  %v149_v1 = vstv (!%p108_p10), %s344_s21  ;;  %141 = vst.msk [vmem:[#allocation2] sm:$0x1] (!%p108_p10), %vm140_vm3, %v513_v57  ;;  %v514_v58 = vmov (!%p108_p10), 0  }
  0x10   : > { %v583_v2 = vshrl.u32 (!%p108_p10), %v145_v0, 7  ;;  %v153_v3 = vand.u32 (!%p108_p10), 127, %v145_v0  ;;  %408 = vset.pattern.permute.xlu0 (!%p108_p10), %v514_v58  ;;  %s125_s26 = sand.u32 (!%p108_p10), 1, %s495_s7   ;;  %s348_s30 = sshll.u32 (!%p108_p10), %s503_s9, 7 }
  0x11   : > { %s341_s27 = sshll.u32 (!%p108_p10), %s125_s26, 3  ;;  %s616_s4 = scalar_lea.hbm (!%p108_p10), %s662_s1, %s348_s30 }
  0x12   : > { %v586_v4 = vadd.s32 (!%p108_p10), %v149_v1, %v583_v2  ;;  %v147_v5 = vadd.s32 (!%p108_p10), 8, %v583_v2  ;;  %s127_s28 = scalar_lea.vmem (!%p108_p10), [#allocation3], %s341_s27  ;;  %s256_s5 = scalar_lea.sflag (!%p108_p10), [#allocation4], %s125_s26 }
  0x13   : > { %s269_s29 = sshll.u32 (!%p108_p10), %s127_s28, 4  ;;  %s515_s13 = smov (!%p108_p10), [#allocation3]   ;;  %s611_s29 = int_to_ptr.vmem [resolvable:$true] %s269_s29 }
  0x14   : > { %vm154_vm1 = vcmp.eq.s32.totalorder (!%p108_p10), %v153_v3, %v586_v4  ;;  %v593_v6 = vadd.s32 (!%p108_p10), %v149_v1, %v147_v5  ;;  %vm225_vm4 = vcmp.lt.s32.totalorder (!%p108_p10), %v586_v4, 13  ;;  %v248_v4 = vsub.s32 (!%p108_p10), 0, %v583_v2  ;;  %s433_s12 = scalar_lea.vmem (!%p108_p10), %s611_s29, 128  ;;  %s437_s9 = sshll.u32 (!%p108_p10), %s515_s13, 4  ;;  %s438_s9 = int_to_ptr.vmem [resolvable:$false] %s437_s9 }
  0x15   : > { %p434_p12 = scmp.ne.s32.totalorder (!%p108_p10), %s611_s29, %s433_s12  ;;  %s439_s15 = scalar_lea.vmem (!%p108_p10), %s438_s9, 256 }
  0x16   : > { %s673_s20 = smov (!%p130_p11, %s342_s20), 3  ;;  %vm155_vm2 = vcmp.eq.s32.totalorder %v153_v3, %v593_v6  ;;  %vm226_vm5 = vcmp.lt.s32.totalorder %v593_v6, 13  ;;  %p440_p1 = scmp.lt.s32.totalorder %s611_s29, %s438_s9 }
  0x17   : > { %s343_s22 = sshll.u32 %s673_s20, 3  ;;  %p435_p13 = pnand %p434_p12, %p566_p4 }
  0x18   : > { %s133_s25 = scalar_lea.vmem %s661_s0, %s343_s22  ;;  %p441_p2 = scmp.lt.s32.totalorder %s439_s15, %s433_s12 }
  0x19   : > { %v142_v7 = vld [vmem:[%s133_s25] sm:$0xff]  ;;  %v143_v8 = vld [vmem:[%s133_s25 + $0x8] sm:$0xff]  ;;  %p436_p0 = pneg %p435_p13 }
  0x1a   : > { %v165_v9 = vsel %vm158_vm0, %v142_v7, -inf  ;;  %v156_v10 = vsel %vm154_vm1, %v142_v7, 0.0  ;;  %v168_v12 = vsel %vm158_vm0, %v143_v8, -inf  ;;  %v157_v13 = vsel %vm155_vm2, %v143_v8, 0.0  ;;  %p442_p3 = por %p441_p2, %p440_p1 }
  0x1b   : > { %166 = vmax.xlane.f32.xlu1 %v165_v9  ;;  %v159_v11 = vsel %vm158_vm0, %v156_v10, 0.0  ;;  %v162_v14 = vsel %vm158_vm0, %v157_v13, 0.0  ;;  %v199_v15 = vmul.f32 %v142_v7, %v142_v7  ;;  %v200_v17 = vmul.f32 %v143_v8, %v143_v8 }
  0x1c   : > { %160 = vadd.xlane.f32.xlu0 %v159_v11  ;;  %p443_p5 = pnand %p442_p3, %p436_p0 }
  0x1d   : > { %v345_v16 = vmul.f32 -1.442695, %v199_v15  ;;  %v346_v22 = vmul.f32 -1.442695, %v200_v17 }
  0x1f   : > { %169 = vmax.xlane.f32.xlu1 %v168_v12  ;;  %409 = vpow2.f32 %v345_v16 }
  0x20   : > { %163 = vadd.xlane.f32.xlu0 %v162_v14  ;;  %v229_v14 = vld [vmem:[#allocation2] sm:$0x1] }
  0x29   : > { %v410_v33 = vpop.eup %409 }
  0x2a   : > { %v207_v35 = vadd.f32 1.0, %v410_v33 }
  0xa8   : > { %v167_v18 = vpop.xlane.xlu1 %166 }
  0xa9   : > { %v171_v19 = vsub.f32 %v142_v7, %v167_v18  ;;  %v161_v20 = vpop.xlane.xlu0 %160 }
  0xaa   : > { %v185_v21 = vsub.f32 %v161_v20, %v167_v18 }
  0xab   : > { %v173_v23 = vmul.f32 1.442695, %v171_v19 }
  0xac   : > { %v187_v24 = vmax.f32 %v185_v21, -80.0  ;;  %v170_v25 = vpop.xlane.xlu1 %169 }
  0xad   : > { %411 = vpow2.f32 %v173_v23  ;;  %v172_v26 = vsub.f32 %v143_v8, %v170_v25  ;;  %v164_v27 = vpop.xlane.xlu0 %163 }
  0xae   : > { %v189_v28 = vmul.f32 1.442695, %v187_v24  ;;  %v186_v29 = vsub.f32 %v164_v27, %v170_v25  ;;  %413 = vpow2.f32 %v346_v22 }
  0xaf   : > { %v175_v30 = vmul.f32 1.442695, %v172_v26 }
  0xb0   : > { %415 = vpow2.f32 %v189_v28  ;;  %v188_v31 = vmax.f32 %v186_v29, -80.0 }
  0xb1   : > { %417 = vpow2.f32 %v175_v30 }
  0xb2   : > { %v191_v32 = vmul.f32 1.442695, %v188_v31 }
  0xb4   : > { %419 = vpow2.f32 %v191_v32 }
  0xb5   : > { %421 = vrcp.f32 %v207_v35 }
  0xb7   : > { %v412_v34 = vpop.eup %411 }
  0xb8   : > { %v177_v36 = vsel %vm158_vm0, %v412_v34, 0.0  ;;  %v414_v37 = vpop.eup %413 }
  0xb9   : > { %178 = vadd.xlane.f32.xlu0 %v177_v36  ;;  %v208_v41 = vadd.f32 1.0, %v414_v37 }
  0xba   : > { %v416_v38 = vpop.eup %415 }
  0xbb   : > { %v418_v39 = vpop.eup %417  ;;  %v193_v40 = vadd.f32 %v416_v38, %v412_v34 }
  0xbc   : > { %v180_v42 = vsel %vm158_vm0, %v418_v39, 0.0 }
  0xbd   : > { %423 = vrcp.f32 %v193_v40  ;;  %181 = vadd.xlane.f32.xlu1 %v180_v42 }
  0xbe   : > { %v420_v43 = vpop.eup %419  ;;  %425 = vrcp.f32 %v208_v41 }
  0xbf   : > { %v194_v44 = vadd.f32 %v420_v43, %v418_v39  ;;  %v422_v45 = vpop.eup %421 }
  0xc1   : > { %427 = vrcp.f32 %v194_v44 }
  0xc7   : > { %v424_v46 = vpop.eup %423 }
  0xc8   : > { %v197_v47 = vmul.f32 %v424_v46, %v412_v34  ;;  %v426_v48 = vpop.eup %425 }
  0xca   : > { %v213_v49 = vadd.f32 %v422_v45, %v197_v47 }
  0xcb   : > { %v428_v50 = vpop.eup %427 }
  0xcc   : > { %v215_v51 = vmul.f32 %v412_v34, %v213_v49  ;;  %v198_v52 = vmul.f32 %v428_v50, %v418_v39 }
  0xce   : > { %v217_v53 = vsel %vm158_vm0, %v215_v51, 0.0  ;;  %v214_v54 = vadd.f32 %v426_v48, %v198_v52 }
  0xcf   : > { %218 = vadd.xlane.f32.xlu0 %v217_v53 }
  0xd0   : > { %v216_v55 = vmul.f32 %v418_v39, %v214_v54 }
  0xd2   : > { %v220_v56 = vsel %vm158_vm0, %v216_v55, 0.0 }
  0xd3   : > { %221 = vadd.xlane.f32.xlu1 %v220_v56 }
 0x146   : > { %v179_v59 = vpop.xlane.xlu0 %178 }
 0x147   : > { %429 = vrcp.f32 %v179_v59 }
 0x14a   : > { %v182_v60 = vpop.xlane.xlu1 %181 }
 0x14b   : > { %431 = vrcp.f32 %v182_v60 }
 0x151   : > { %v430_v62 = vpop.eup %429 }
 0x155   : > { %v432_v0 = vpop.eup %431 }
 0x15c   : > { %v219_v61 = vpop.xlane.xlu0 %218 }
 0x15d   : > { %v223_v63 = vmul.f32 %v430_v62, %v219_v61 }
 0x15f   : > { %v227_v5 = vsel %vm225_vm4, %v223_v63, 0.0 }
 0x160   : > { %v222_v1 = vpop.xlane.xlu1 %221 }
 0x161   : > { %v224_v3 = vmul.f32 %v432_v0, %v222_v1 }
 0x163   : > { %v228_v7 = vsel %vm226_vm5, %v224_v3, 0.0 }
 0x164   : > { %v230_v8 = vadd.f32 %v228_v7, %v227_v5 }
 0x166   : > { %v231_v9 = vrot.slane %v230_v8, 4 }
 0x168   : > { %v232_v10 = vadd.f32 %v231_v9, %v230_v8 }
 0x16a   : > { %v233_v11 = vrot.slane %v232_v10, 2 }
 0x16c   : > { %v234_v12 = vadd.f32 %v233_v11, %v232_v10 }
 0x16e   : > { %v235_v13 = vrot.slane %v234_v12, 1 }
 0x170   : > { %v236_v15 = vadd.f32 %v235_v13, %v234_v12 }
 0x172   : > { %v237_v16 = vadd.f32 %v236_v15, %v229_v14 }
 0x174   : > { %239 = vst.msk [vmem:[#allocation2] sm:$0x1] %vm140_vm3, %v237_v16 }
 0x17b   : > { %v243_v6 = vld [vmem:[#allocation2] sm:$0x1] }
 0x17c   : > { %v244_v17 = vmul.f32 0.00591716, %v243_v6 }
 0x17e   : > { %v249_v18 = vrot.slane %v244_v17, %v248_v4 }
 0x180   : > { %251 = vperm.xlu0 %408, %v249_v18  }
 0x1ff   : > { %v252_v2 = vpop.permute.xlu0 %251 }
 0x200   : > { %254 = vst [vmem:[%s127_s28] sm:$0xff] %v252_v2 }
 0x201   : > { %446 = shalt.err (!%p443_p5)
}
 0x202   : > { %s447_s17 = scalar_lea.hbm %s616_s4, 128  ;;  %s451_s22 = scalar_lea.hbm %s662_s1, 256 }
 0x203   : > { %p448_p6 = scmp.ne.s32.totalorder %s616_s4, %s447_s17  ;;  %p452_p10 = scmp.lt.u32.totalorder %s616_s4, %s662_s1 }
 0x204   : > { %p453_p11 = scmp.lt.u32.totalorder %s451_s22, %s447_s17  ;;  %p455_p13 = scmp.lt.u32.totalorder %s447_s17, %s616_s4 }
 0x205   : > { %p449_p7 = pnand %p448_p6, %p566_p4 }
 0x206   : > { %p454_p12 = por %p453_p11, %p452_p10 }
 0x207   : > { %p450_p9 = pneg %p449_p7 }
 0x208   : > { %p456_p0 = por %p455_p13, %p454_p12 }
 0x20a   : > { %p457_p1 = pnand %p456_p0, %p450_p9 }
 0x20c   : > { %460 = shalt.err (!%p457_p1)
}
 0x20d   : > { %351 = dma.vmem_to_hbm [thread:$0]  (%p566_p4), %s611_s29, 128, %s616_s4, %s256_s5  }
 0x20e PF: > { %p357_p2 = scmp.ge.s32.totalorder %s511_s11, 2  ;;  %s281_s25 = sand.u32 1, %s491_s6  }
 0x20f   : > { %s282_s26 = scalar_lea.sflag [#allocation4], %s281_s25 }
 0x210   : > { %p354_p3 = pnand %p357_p2, %p573_p8 }
 0x212   : > { %486 = dma.done.wait (!%p354_p3), %s282_s26, 128  }
 0x213   : > { %488 = vsyncadd (!%p354_p3), %s282_s26, 4294967168  ;;  %s14_s11 = sadd.s32 1, %s511_s11   ;;  %s665_s6 = smov %s495_s7 }
 0x214   : > { %p11_p5 = scmp.ge.s32.totalorder %s14_s11, 4   ;;  %s666_s7 = smov %s499_s8 }
 0x215   : > { %s667_s8 = smov %s579_s19  ;;  %s668_s9 = smov %s507_s10 }
 0x216   : > { %s669_s10 = smov %s671_s14  ;;  %13 = sbr.rel (!%p11_p5) target bundleno = 4 (0x4), region = 67 }
 0x21d   :  { %287 = vsyncpa [#allocation4], 1 }
 0x21e   :  { %289 = vsyncpa [#allocation4 + $0x1], 1 }

</bundles_post_ra>
